<compile_context>
chip_gen: v6e
topology: v6e:2x2x1
jax: 0.10.0
libtpu: 0.0.40
codegen_flags: <defaults>
</compile_context>

<pallas_src>
import jax
import jax.numpy as jnp
import numpy as np
from jax.experimental import pallas as pl
from jax.experimental.pallas import tpu as pltpu


def _round_up(x, m):
    return (x + m - 1) // m * m


def _sublane_multiple(dtype):
    # 8 for 4-byte, 16 for 2-byte, 32 for 1-byte operands.
    return max(8, 32 // np.dtype(dtype).itemsize)


def _vmem_info():
    """Generation-aware VMEM capacity / scoped limit."""
    try:
        cap = int(pltpu.get_tpu_info().vmem_capacity_bytes)
    except Exception:
        cap = 64 * 1024 * 1024          # conservative (v7x-class) fallback
    # 48 MiB on v7x (64 MiB/TC), 96 MiB on v5e/v6e (128 MiB).
    limit = int(min(cap * 3 // 4, 96 * 1024 * 1024))
    return cap, limit


def _pick_tile(B, D, C, op_dtype, tb, vmem_cap, vmem_limit):
    """Pick the batch tile TB (rows per grid step)."""
    sub = _sublane_multiple(op_dtype)
    b_rounded = _round_up(B, sub)
    if tb is not None:
        # Explicit request: just make it layout-legal for the operand dtype.
        return _round_up(min(tb, b_rounded), sub)

    itemsize = np.dtype(op_dtype).itemsize
    two_cd = 2 * C * D
    # Per-row VMEM bytes of one in-flight tile:
    #   p / tile(v) / pv f32 intermediates : 3 * 2CD * 4
    #   f32 copy of v                      : D * 4
    #   u, v input blocks, double-buffered : 2 * 2 * D * itemsize
    #   output block, double-buffered      : 2 * 4
    row_bytes = 3 * two_cd * 4 + D * 4 + 4 * D * itemsize + 8
    fixed = D * two_cd * itemsize + two_cd * 2 * C * 4 + (2 << 20)  # w + seg + slack
    tb_cap = max(sub, ((vmem_limit - fixed) // row_bytes) // sub * sub)
    # Generation cap: v7x (<= 64 MiB VMEM/TC) -> 4096, v5e/v6e -> 8192.
    gen_cap = 4096 if vmem_cap <= 64 * 1024 * 1024 else 8192
    TB = min(gen_cap, tb_cap)
    # Prefer >= 2 grid steps when the batch can be split so dual-TensorCore
    # parts (v7x) shard the "parallel" batch axis across both cores.
    if B > 2 * sub:
        TB = min(TB, _round_up(pl.cdiv(B, 2), sub))
    return max(sub, min(TB, b_rounded))


def mixture_kernel(u_ref, v_ref, w_ref, seg_ref, out_ref):
    # Static shapes.
    D = w_ref.shape[0]
    two_cd = w_ref.shape[1]          # 2 * C * D
    C = two_cd // (2 * D)

    u = u_ref[...]                               # (TB, D)  operand dtype -> MXU
    w = w_ref[...]                               # (D, 2CD) operand dtype -> MXU
    v = v_ref[...].astype(jnp.float32)           # (TB, D)  f32 for VPU work

    # Fused projection: P = [tastes | attention] flattened along lanes.
    p = jnp.dot(u, w, preferred_element_type=jnp.float32)         # (TB, 2CD) f32

    # Multiply every D-wide segment by the item embedding (lane-dense VPU op).
    # NOTE: tile() materializes one extra (TB, 2CD) f32 buffer; it is counted
    # in the per-row VMEM budget used to size TB (see _pick_tile).
    pv = p * jnp.tile(v, (1, 2 * C))                               # (TB, 2CD)

    # Segmented lane-reduce on the MXU against the hoisted block-diagonal
    # ones matrix: scores[:, j] = sum over segment j.
    scores = jnp.dot(pv, seg_ref[...], preferred_element_type=jnp.float32)  # (TB, 2C)

    q = scores[:, :C]          # q[b,c]      = sum_d tastes[b,c,d]    * v[b,d]
    logits = scores[:, C:]     # logits[b,c] = sum_d attention[b,c,d] * v[b,d]

    # Softmax over the component axis (matches F.softmax dim=1 on 2-D input).
    m = jnp.max(logits, axis=1, keepdims=True)
    e = jnp.exp(logits - m)
    attn = e / jnp.sum(e, axis=1, keepdims=True)                   # (TB, C)

    # dot[b] = sum_c attn[b,c] * q[b,c]   (weighted_preference never materialized)
    out_ref[...] = jnp.sum(attn * q, axis=1, keepdims=True)        # (TB, 1)


def mixture_net_forward(user_ids, item_ids, params, operand_dtype=None, tb=None):
    """Glue: id padding + gathers + bias in JAX, mixture compute in Pallas."""
    C = params["num_components"]
    D = params["embedding_dim"]

    # Operand tables (bf16 by default, precast once in init_params).
    if operand_dtype is None or np.dtype(operand_dtype) == params["user_emb_op"].dtype:
        u_tab, v_tab, w_all = params["user_emb_op"], params["item_emb_op"], params["w_all_op"]
    else:
        u_tab = params["user_emb"].astype(operand_dtype)
        v_tab = params["item_emb"].astype(operand_dtype)
        w_all = params["w_all"].astype(operand_dtype)
    op_dtype = u_tab.dtype
    seg = params["seg"]                                            # (2CD, 2C) f32

    # Biases from the ORIGINAL (unpadded) ids.
    bias = (params["user_bias"][user_ids][:, 0]
            + params["item_bias"][item_ids][:, 0])                 # (B,) f32

    B = int(user_ids.shape[0])
    vmem_cap, vmem_limit = _vmem_info()
    TB = _pick_tile(B, D, C, op_dtype, tb, vmem_cap, vmem_limit)
    Bp = _round_up(B, TB)

    # Pad the cheap int32 id vectors (not the gathered (B, D) embeddings).
    # Index 0 is a valid row; padded outputs are sliced off below.
    if Bp != B:
        pad = Bp - B
        user_ids = jnp.pad(user_ids, (0, pad))
        item_ids = jnp.pad(item_ids, (0, pad))

    u = u_tab[user_ids]                                            # (Bp, D) op dtype
    v = v_tab[item_ids]                                            # (Bp, D) op dtype
    two_cd = 2 * C * D

    out = pl.pallas_call(
        mixture_kernel,
        out_shape=jax.ShapeDtypeStruct((Bp, 1), jnp.float32),
        grid_spec=pltpu.PrefetchScalarGridSpec(
            num_scalar_prefetch=0,
            grid=(Bp // TB,),
            in_specs=[
                pl.BlockSpec((TB, D), lambda i: (i, 0)),           # u tile
                pl.BlockSpec((TB, D), lambda i: (i, 0)),           # v tile
                pl.BlockSpec((D, two_cd), lambda i: (0, 0)),       # weights pinned
                pl.BlockSpec((two_cd, 2 * C), lambda i: (0, 0)),   # seg-sum pinned
            ],
            out_specs=pl.BlockSpec((TB, 1), lambda i: (i, 0)),
        ),
        compiler_params=pltpu.CompilerParams(
            dimension_semantics=("parallel",),      # megacore / v7x dual-TC sharding
            vmem_limit_bytes=vmem_limit,            # generation-aware (48/96 MiB)
            # Let XLA fuse the pad+gather+cast producing u/v into the kernel's
            # input pipeline instead of round-tripping them through HBM.
            allow_input_fusion=[True, True, False, False],
        ),
    )(u, v, w_all, seg)

    return out[:B, 0] + bias                                       # (B,) f32


def init_params(key, num_users, num_items, embedding_dim=32,
                projection_scale=1.0, num_components=4,
                operand_dtype=jnp.bfloat16):
    k_u, k_i, k_t, k_a = jax.random.split(key, 4)
    # ScaledEmbedding: normal(0,1) / embedding_dim
    user_emb = jax.random.normal(k_u, (num_users, embedding_dim), jnp.float32) / embedding_dim
    item_emb = jax.random.normal(k_i, (num_items, embedding_dim), jnp.float32) / embedding_dim
    # ZeroEmbedding: zeros
    user_bias = jnp.zeros((num_users, 1), jnp.float32)
    item_bias = jnp.zeros((num_items, 1), jnp.float32)
    # xavier_normal(gain=projection_scale) on Linear(D, C*D) weights, shape (C*D, D)
    fan_out = embedding_dim * num_components
    fan_in = embedding_dim
    std = projection_scale * jnp.sqrt(2.0 / (fan_in + fan_out))
    taste_w = std * jax.random.normal(k_t, (fan_out, fan_in), jnp.float32)
    attention_w = std * jax.random.normal(k_a, (fan_out, fan_in), jnp.float32)

    # Hoisted weight prep (once, not per forward): PyTorch computes y = x @ W.T,
    # so the (in, out) matrix is W.T. Concatenate taste/attention along the
    # output axis -> a single lane-dense (D, 2*C*D) MXU operand.
    w_all = jnp.concatenate([taste_w.T, attention_w.T], axis=1)    # (D, 2*C*D) f32

    # Hoisted block-diagonal segment-sum matrix (was iota'd inside the kernel):
    # seg[r, j] = 1 iff r // D == j.
    two_cd = 2 * num_components * embedding_dim
    seg = (np.arange(two_cd)[:, None] // embedding_dim
           == np.arange(2 * num_components)[None, :]).astype(np.float32)

    return dict(
        # f32 masters (reference / recasting)
        user_emb=user_emb, item_emb=item_emb,
        user_bias=user_bias, item_bias=item_bias,
        taste_w=taste_w, attention_w=attention_w, w_all=w_all,
        seg=jnp.asarray(seg),
        # operand-dtype copies stored in HBM (bf16 default: half the DMA bytes)
        user_emb_op=user_emb.astype(operand_dtype),
        item_emb_op=item_emb.astype(operand_dtype),
        w_all_op=w_all.astype(operand_dtype),
        embedding_dim=embedding_dim, num_components=num_components,
    )


def reference_forward(user_ids, item_ids, params):
    """Pure-JAX f32 reference mirroring the PyTorch module exactly."""
    C, D = params["num_components"], params["embedding_dim"]
    u = params["user_emb"][user_ids]
    v = params["item_emb"][item_ids]
    tastes = (u @ params["taste_w"].T).reshape(-1, C, D)
    att = (u @ params["attention_w"].T).reshape(-1, C, D)
    logits = jnp.sum(att * v[:, None, :], axis=2)
    attn = jax.nn.softmax(logits, axis=1)[:, :, None]
    wp = jnp.sum(tastes * attn, axis=1)
    dot = jnp.sum(wp * v, axis=1)
    return dot + params["user_bias"][user_ids][:, 0] + params["item_bias"][item_ids][:, 0]


if __name__ == "__main__":
    key = jax.random.PRNGKey(0)
    num_users, num_items = 16, 20
    embedding_dim, num_components = 32, 4

    params = init_params(key, num_users, num_items,
                         embedding_dim=embedding_dim,
                         num_components=num_components,
                         operand_dtype=jnp.bfloat16)

    # Batch of 8.
    k1, k2 = jax.random.split(jax.random.PRNGKey(0))
    user_ids = jax.random.randint(k1, (8,), 0, num_users)
    item_ids = jax.random.randint(k2, (8,), 0, num_items)
    ref = jax.block_until_ready(reference_forward(user_ids, item_ids, params))

    # Default path: bf16 operand tables (halves HBM traffic; f32 accumulate/VPU).
    out_bf16 = jax.block_until_ready(mixture_net_forward(user_ids, item_ids, params))
    np.testing.assert_allclose(np.asarray(out_bf16), np.asarray(ref),
                               rtol=5e-2, atol=1e-3)

    # f32 operand path: matches the reference to matmul-accumulation tolerance.
    out_f32 = jax.block_until_ready(
        mixture_net_forward(user_ids, item_ids, params, operand_dtype=jnp.float32))
    np.testing.assert_allclose(np.asarray(out_f32), np.asarray(ref),
                               rtol=1e-5, atol=1e-5)

    # Non-multiple batch: id padding, multi-step grid, per-dtype sublane rounding.
    k3, k4 = jax.random.split(jax.random.PRNGKey(1))
    uid2 = jax.random.randint(k3, (13,), 0, num_users)
    iid2 = jax.random.randint(k4, (13,), 0, num_items)
    ref2 = jax.block_until_ready(reference_forward(uid2, iid2, params))
    out2_f32 = jax.block_until_ready(
        mixture_net_forward(uid2, iid2, params, operand_dtype=jnp.float32, tb=8))
    np.testing.assert_allclose(np.asarray(out2_f32), np.asarray(ref2),
                               rtol=1e-5, atol=1e-5)
    out2_bf16 = jax.block_until_ready(mixture_net_forward(uid2, iid2, params))
    np.testing.assert_allclose(np.asarray(out2_bf16), np.asarray(ref2),
                               rtol=5e-2, atol=1e-3)

    # Larger batch: auto tile picker + >= 2 "parallel" grid steps.
    k5, k6 = jax.random.split(jax.random.PRNGKey(2))
    uid3 = jax.random.randint(k5, (200,), 0, num_users)
    iid3 = jax.random.randint(k6, (200,), 0, num_items)
    ref3 = jax.block_until_ready(reference_forward(uid3, iid3, params))
    out3 = jax.block_until_ready(mixture_net_forward(uid3, iid3, params))
    np.testing.assert_allclose(np.asarray(out3), np.asarray(ref3),
                               rtol=5e-2, atol=1e-3)

    print("KERNEL_OK")
</pallas_src>

<mosaic_0001>
module attributes {stable_mosaic.version = 11 : i64} {
  func.func @mixture_kernel(%arg0: i32, %arg1: memref<16x32xbf16, #tpu.memory_space<vmem>>, %arg2: memref<16x32xbf16, #tpu.memory_space<vmem>>, %arg3: memref<32x256xbf16, #tpu.memory_space<vmem>>, %arg4: memref<256x8xf32, #tpu.memory_space<vmem>>, %arg5: memref<16x1xf32, #tpu.memory_space<vmem>>) attributes {dimension_semantics = [#tpu.dimension_semantics<parallel>], iteration_bounds = array<i64: 1>, scalar_prefetch = 0 : i64, scratch_operands = 0 : i64, tpu.core_type = #tpu.core_type<tc>, window_params = [{transform_indices = @transform_0, window_bounds = array<i64: 16, 32>}, {transform_indices = @transform_1, window_bounds = array<i64: 16, 32>}, {pipeline_mode = #tpu.pipeline_mode<synchronous>, transform_indices = @transform_2, window_bounds = array<i64: 32, 256>}, {pipeline_mode = #tpu.pipeline_mode<synchronous>, transform_indices = @transform_3, window_bounds = array<i64: 256, 8>}, {transform_indices = @transform_4, window_bounds = array<i64: 16, 1>}]} {
    %c0 = arith.constant 0 : index
    %c0_0 = arith.constant 0 : index
    %0 = vector.load %arg1[%c0, %c0_0] : memref<16x32xbf16, #tpu.memory_space<vmem>>, vector<16x32xbf16>
    %c0_1 = arith.constant 0 : index
    %c0_2 = arith.constant 0 : index
    %1 = vector.load %arg3[%c0_1, %c0_2] : memref<32x256xbf16, #tpu.memory_space<vmem>>, vector<32x256xbf16>
    %c0_3 = arith.constant 0 : index
    %c0_4 = arith.constant 0 : index
    %2 = vector.load %arg2[%c0_3, %c0_4] : memref<16x32xbf16, #tpu.memory_space<vmem>>, vector<16x32xbf16>
    %3 = arith.extf %2 : vector<16x32xbf16> to vector<16x32xf32>
    %cst = arith.constant dense<0.000000e+00> : vector<16x256xf32>
    %4 = tpu.matmul %0, %1, %cst {dimension_numbers = #tpu.dot_dimension_numbers<[1], [0], [0], [1], [0, 0, 1, 1], [], []>} : vector<16x32xbf16>, vector<32x256xbf16>, vector<16x256xf32> -> vector<16x256xf32>
    %5 = tpu.concatenate %3, %3, %3, %3, %3, %3, %3, %3 in 1 : vector<16x32xf32>, vector<16x32xf32>, vector<16x32xf32>, vector<16x32xf32>, vector<16x32xf32>, vector<16x32xf32>, vector<16x32xf32>, vector<16x32xf32> -> vector<16x256xf32>
    %6 = arith.mulf %4, %5 : vector<16x256xf32>
    %c0_5 = arith.constant 0 : index
    %c0_6 = arith.constant 0 : index
    %7 = vector.load %arg4[%c0_5, %c0_6] : memref<256x8xf32, #tpu.memory_space<vmem>>, vector<256x8xf32>
    %cst_7 = arith.constant dense<0.000000e+00> : vector<16x8xf32>
    %8 = tpu.matmul %6, %7, %cst_7 {dimension_numbers = #tpu.dot_dimension_numbers<[1], [0], [0], [1], [0, 0, 1, 1], [], []>} : vector<16x256xf32>, vector<256x8xf32>, vector<16x8xf32> -> vector<16x8xf32>
    %9 = vector.extract_strided_slice %8 {offsets = [0, 0], sizes = [16, 4], strides = [1, 1]} : vector<16x8xf32> to vector<16x4xf32>
    %10 = vector.extract_strided_slice %8 {offsets = [0, 4], sizes = [16, 4], strides = [1, 1]} : vector<16x8xf32> to vector<16x4xf32>
    %cst_8 = arith.constant dense<0xFF800000> : vector<16xf32>
    %11 = vector.multi_reduction <maximumf>, %10, %cst_8 [1] : vector<16x4xf32> to vector<16xf32>
    %12 = vector.shape_cast %11 : vector<16xf32> to vector<16x1xf32>
    %13 = vector.broadcast %12 : vector<16x1xf32> to vector<16x4xf32>
    %14 = arith.subf %10, %13 : vector<16x4xf32>
    %15 = math.exp %14 : vector<16x4xf32>
    %cst_9 = arith.constant dense<0.000000e+00> : vector<16xf32>
    %16 = vector.multi_reduction <add>, %15, %cst_9 [1] : vector<16x4xf32> to vector<16xf32>
    %17 = vector.shape_cast %16 : vector<16xf32> to vector<16x1xf32>
    %18 = vector.broadcast %17 : vector<16x1xf32> to vector<16x4xf32>
    %19 = arith.divf %15, %18 : vector<16x4xf32>
    %20 = arith.mulf %19, %9 : vector<16x4xf32>
    %cst_10 = arith.constant dense<0.000000e+00> : vector<16xf32>
    %21 = vector.multi_reduction <add>, %20, %cst_10 [1] : vector<16x4xf32> to vector<16xf32>
    %22 = vector.shape_cast %21 : vector<16xf32> to vector<16x1xf32>
    %c0_11 = arith.constant 0 : index
    %c0_12 = arith.constant 0 : index
    %23 = vector.load %arg5[%c0_11, %c0_12] : memref<16x1xf32, #tpu.memory_space<vmem>>, vector<16x1xf32>
    tpu.vector_store %arg5[%c0_11, %c0_12], %22 {strides = array<i32>} : memref<16x1xf32, #tpu.memory_space<vmem>>, vector<16x1xf32>,
    return
  }
  func.func @transform_0(%arg0: i32) -> (i32, i32) {
    %c0_i32 = arith.constant 0 : i32
    %c0_i32_0 = arith.constant 0 : i32
    return %arg0, %c0_i32 : i32, i32
  }
  func.func @transform_1(%arg0: i32) -> (i32, i32) {
    %c0_i32 = arith.constant 0 : i32
    %c0_i32_0 = arith.constant 0 : i32
    return %arg0, %c0_i32 : i32, i32
  }
  func.func @transform_2(%arg0: i32) -> (i32, i32) {
    %c0_i32 = arith.constant 0 : i32
    %c0_i32_0 = arith.constant 0 : i32
    %c0_i32_1 = arith.constant 0 : i32
    return %c0_i32, %c0_i32_0 : i32, i32
  }
  func.func @transform_3(%arg0: i32) -> (i32, i32) {
    %c0_i32 = arith.constant 0 : i32
    %c0_i32_0 = arith.constant 0 : i32
    %c0_i32_1 = arith.constant 0 : i32
    return %c0_i32, %c0_i32_0 : i32, i32
  }
  func.func @transform_4(%arg0: i32) -> (i32, i32) {
    %c0_i32 = arith.constant 0 : i32
    %c0_i32_0 = arith.constant 0 : i32
    return %arg0, %c0_i32 : i32, i32
  }
}

</mosaic_0001>

<bundles_post_ra>
// kernel: tpu_custom_call.1
= control target key start
LH: loop header
LB: loop body
LE: loop exit
PB: predicated region body
PF: predicated region fallthrough
CT: control target
= control target key end

     0   :  { %v371_v1 = vmov 0   ;;  %s373_s6 = smov 96   ;;  %vm53_vm0 = vcmask 261120   ;;  %s374_s12 = smov 64   ;;  %vm122_vm1 = vcmask 523264   ;;  %vm125_vm2 = vcmask 785408   ;;  %s541_s2 = inlined_call_operand.vmem [shape: bf16[32,256], index: 2, kind: input, shape index: {}]   ;;  %s542_s1 = inlined_call_operand.vmem [shape: bf16[16,32], index: 1, kind: input, shape index: {}]   ;;  %s543_s0 = inlined_call_operand.vmem [shape: bf16[16,32], index: 0, kind: input, shape index: {}]   ;;  %s544_s3 = inlined_call_operand.vmem [shape: f32[256,8], index: 3, kind: input, shape index: {}]   ;;  %s545_s4 = inlined_call_operand.vmem [shape: f32[16,1], index: 4, kind: output, shape index: {}]  }
   0x1   :  { %v356_v0 = vld [vmem:[%s541_s2 + $0x14] ss:$8 sps:$4 sm:$0xff]   ;;  %89 = vmatprep.mubr.bf16.mxu0 %v371_v1  ;;  %v358_v2 = vld [vmem:[%s541_s2 + $0x10] ss:$8 sps:$4 sm:$0xff]   ;;  %v359_v3 = vld [vmem:[%s541_s2 + $0x4] ss:$8 sps:$4 sm:$0xff]  }
   0x2   :  { %69 = vmatprep.subr.bf16.mxu0 %v356_v0  ;;  %v361_v4 = vld [vmem:[%s541_s2] ss:$8 sps:$4 sm:$0xff]   ;;  %v163_v7 = vld [vmem:[%s544_s3 + $0xf8] sm:$0xff]  ;;  %v162_v9 = vld [vmem:[%s544_s3 + $0xf0] sm:$0xff]  ;;  %vm239_vm3 = vcmask 64544   ;;  %vm260_vm4 = vcmask 31744  }
   0x3   :  { %70 = vmatpush1.bf16.msra.mxu0 %v358_v2  ;;  %v309_v5 = vld [vmem:[%s542_s1] sm:$0xff]   ;;  %v147_v8 = vld [vmem:[%s544_s3 + $0x78] sm:$0xff]  ;;  %312 = vmatprep.subr.mxu1 %v163_v7  ;;  %s372_s1 = smov 32   ;;  %v146_v11 = vld [vmem:[%s544_s3 + $0x70] sm:$0xff]  ;;  %s376_s8 = smov 4   ;;  %vm295_vm5 = vcmask 7168  }
   0x4   :  { %71 = vmatprep.subr.bf16.mxu0 %v359_v3  ;;  %v417_v6 = vunpack.c.l.bf16 %v309_v5  ;;  %v362_v10 = vld [vmem:[%s543_s0] sm:$0xff]   ;;  %v436_v12 = vunpack.c.h.bf16 %v309_v5  ;;  %313 = vmatpush3.msra.mxu1 %v147_v8  ;;  %v161_v13 = vld [vmem:[%s544_s3 + $0xe8] sm:$0xff]  ;;  %v159_v17 = vld [vmem:[%s544_s3 + $0xd8] sm:$0xff] }
   0x5   :  { %314 = vmatprep.subr.mxu1 %v162_v9  ;;  %v145_v14 = vld [vmem:[%s544_s3 + $0x68] sm:$0xff]  ;;  %v160_v15 = vld [vmem:[%s544_s3 + $0xe0] sm:$0xff]  ;;  %v143_v18 = vld [vmem:[%s544_s3 + $0x58] sm:$0xff] }
   0x6   :  { %102 = vrot.lane.b32.xlu0 %v417_v6, %s372_s1  ;;  %114 = vrot.lane.b32.xlu1 %v417_v6, %s373_s6  ;;  %v144_v16 = vld [vmem:[%s544_s3 + $0x60] sm:$0xff]  ;;  %v158_v19 = vld [vmem:[%s544_s3 + $0xd0] sm:$0xff] }
   0x7   :  { %72 = vmatpush1.bf16.msra.mxu0 %v361_v4  ;;  %315 = vmatpush3.msra.mxu1 %v146_v11  ;;  %v142_v20 = vld [vmem:[%s544_s3 + $0x50] sm:$0xff]  ;;  %v157_v21 = vld [vmem:[%s544_s3 + $0xc8] sm:$0xff]  ;;  %v156_v23 = vld [vmem:[%s544_s3 + $0xc0] sm:$0xff] }
   0x8   :  { %316 = vmatprep.subr.mxu1 %v161_v13  ;;  %v141_v22 = vld [vmem:[%s544_s3 + $0x48] sm:$0xff]  ;;  %v140_v24 = vld [vmem:[%s544_s3 + $0x40] sm:$0xff]  ;;  %v155_v25 = vld [vmem:[%s544_s3 + $0xb8] sm:$0xff] }
   0x9   :  { %317 = vmatpush3.msra.mxu1 %v145_v14  ;;  %v139_v26 = vld [vmem:[%s544_s3 + $0x38] sm:$0xff]  ;;  %v154_v27 = vld [vmem:[%s544_s3 + $0xb0] sm:$0xff]  ;;  %v153_v29 = vld [vmem:[%s544_s3 + $0xa8] sm:$0xff] }
   0xa   :  { %307 = vmatmul.mubr.msk.bf16.vlgmr.msra.gmra.mxu0 %vm53_vm0, %v362_v10  ;;  %108 = vrot.lane.b32.xlu0 %v417_v6, %s374_s12  ;;  %v138_v28 = vld [vmem:[%s544_s3 + $0x30] sm:$0xff]  ;;  %v137_v30 = vld [vmem:[%s544_s3 + $0x28] sm:$0xff]  ;;  %v152_v31 = vld [vmem:[%s544_s3 + $0xa0] sm:$0xff] }
   0xb   :  { %104 = vrot.lane.b32.xlu1 %v436_v12, %s372_s1  ;;  %318 = vmatprep.subr.mxu1 %v160_v15  ;;  %v136_v32 = vld [vmem:[%s544_s3 + $0x20] sm:$0xff]  ;;  %v151_v33 = vld [vmem:[%s544_s3 + $0x98] sm:$0xff]  ;;  %v150_v35 = vld [vmem:[%s544_s3 + $0x90] sm:$0xff] }
   0xc   :  { %319 = vmatpush3.msra.mxu1 %v144_v16  ;;  %v135_v34 = vld [vmem:[%s544_s3 + $0x18] sm:$0xff]  ;;  %v134_v36 = vld [vmem:[%s544_s3 + $0x10] sm:$0xff]  ;;  %v149_v37 = vld [vmem:[%s544_s3 + $0x88] sm:$0xff] }
   0xd   :  { %320 = vmatprep.subr.mxu1 %v159_v17  ;;  %v133_v38 = vld [vmem:[%s544_s3 + $0x8] sm:$0xff]  ;;  %v148_v39 = vld [vmem:[%s544_s3 + $0x80] sm:$0xff] }
   0xe   :  { %110 = vrot.lane.b32.xlu0 %v436_v12, %s374_s12  ;;  %321 = vmatpush3.msra.mxu1 %v143_v18  ;;  %v132_v40 = vld [vmem:[%s544_s3] sm:$0xff]  ;;  %s375_s3 = smov 124  }
   0xf   :  { %116 = vrot.lane.b32.xlu1 %v436_v12, %s373_s6  ;;  %322 = vmatprep.subr.mxu1 %v158_v19 }
  0x10   :  { %323 = vmatpush3.msra.mxu1 %v142_v20 }
  0x11   :  { %324 = vmatprep.subr.mxu1 %v157_v21 }
  0x12   :  { %325 = vmatpush3.msra.mxu1 %v141_v22 }
  0x13   :  { %326 = vmatprep.subr.mxu1 %v156_v23 }
  0x14   :  { %327 = vmatpush3.msra.mxu1 %v140_v24 }
  0x15   :  { %328 = vmatprep.subr.mxu1 %v155_v25 }
  0x16   :  { %329 = vmatpush3.msra.mxu1 %v139_v26 }
  0x17   :  { %330 = vmatprep.subr.mxu1 %v154_v27 }
  0x18   :  { %331 = vmatpush3.msra.mxu1 %v138_v28 }
  0x19   :  { %332 = vmatprep.subr.mxu1 %v153_v29 }
  0x1a   :  { %333 = vmatpush3.msra.mxu1 %v137_v30 }
  0x1b   :  { %334 = vmatprep.subr.mxu1 %v152_v31 }
  0x1c   :  { %335 = vmatpush3.msra.mxu1 %v136_v32 }
  0x1d   :  { %336 = vmatprep.subr.mxu1 %v151_v33 }
  0x1e   :  { %337 = vmatpush3.msra.mxu1 %v135_v34 }
  0x1f   :  { %338 = vmatprep.subr.mxu1 %v150_v35 }
  0x20   :  { %339 = vmatpush3.msra.mxu1 %v134_v36 }
  0x21   :  { %340 = vmatprep.subr.mxu1 %v149_v37 }
  0x22   :  { %341 = vmatpush3.msra.mxu1 %v133_v38 }
  0x23   :  { %342 = vmatprep.subr.mxu1 %v148_v39 }
  0x24   :  { %343 = vmatpush3.msra.mxu1 %v132_v40 }
  0x78   :  { %v103_v41 = vpop.permute.xlu0 %102  ;;  %v115_v42 = vpop.permute.xlu1 %114 }
  0x79   :  { %v120_v44 = vsel %vm53_vm0, %v417_v6, %v103_v41 }
  0x7c   :  { %v109_v43 = vpop.permute.xlu0 %108 }
  0x7d   :  { %v105_v45 = vpop.permute.xlu1 %104  ;;  %v123_v46 = vsel %vm122_vm1, %v120_v44, %v109_v43 }
  0x7e   :  { %v121_v47 = vsel %vm53_vm0, %v436_v12, %v105_v45  ;;  %v126_v50 = vsel %vm125_vm2, %v123_v46, %v115_v42 }
  0x80   :  { %v111_v48 = vpop.permute.xlu0 %110 }
  0x81   :  { %v124_v51 = vsel %vm122_vm1, %v121_v47, %v111_v48  ;;  %v117_v53 = vpop.permute.xlu1 %116 }
  0x82   :  { %v127_v57 = vsel %vm125_vm2, %v124_v51, %v117_v53 }
  0xca   :  { %v91_v49 = vpop.f32.mrf.mxu0 }
  0xcb   :  { %v128_v55 = vmul.f32 %v126_v50, %v91_v49 }
  0xcc   :  { %v93_v52 = vpop.f32.mrf.mxu0 }
  0xcd   :  { %v129_v54 = vmul.f32 %v126_v50, %v93_v52 }
  0xce   :  { %v95_v56 = vpop.f32.mrf.mxu0 }
  0xcf   :  { %228 = vmatprep.mubr.f32.mxu1 %v129_v54  ;;  %v130_v60 = vmul.f32 %v127_v57, %v95_v56 }
  0xd0   :  { %v97_v58 = vpop.f32.mrf.mxu0  ;;  %229 = vmatmul.mubr.f32.vlgmr.msra.gmra.mxu1 %v128_v55 }
  0xd1   :  { %v131_v59 = vmul.f32 %v127_v57, %v97_v58 }
  0xd3   :  { %233 = vmatprep.mubr.f32.mxu1 %v131_v59 }
  0xd4   :  { %234 = vmatmul.mubr.f32.gmra.mxu1 %v130_v60 }
 0x190   :  { %v344_v61 = vpop.f32.mrf.mxu1 }
 0x192   :  { %v345_v62 = vpop.f32.mrf.mxu1 }
 0x193   :  { %v346_v63 = vadd.f32 %v345_v62, %v344_v61 }
 0x194   :  { %v347_v0 = vpop.f32.mrf.mxu1 }
 0x195   :  { %v240_v1 = vsel %vm239_vm3, %v346_v63, -inf }
 0x196   :  { %241 = vmax.xlane.f32.xlu0 %v240_v1  ;;  %v348_v2 = vpop.f32.mrf.mxu1 }
 0x197   :  { %v349_v3 = vadd.f32 %v348_v2, %v347_v0 }
 0x199   :  { %v243_v4 = vsel %vm239_vm3, %v349_v3, -inf }
 0x19a   :  { %244 = vmax.xlane.f32.xlu1 %v243_v4 }
 0x21f   :  { %v242_v5 = vpop.xlane.xlu0 %241 }
 0x220   :  { %v246_v6 = vsub.f32 %v346_v63, %v242_v5 }
 0x222   :  { %v248_v7 = vmul.f32 1.442695, %v246_v6 }
 0x223   :  { %v245_v8 = vpop.xlane.xlu1 %244 }
 0x224   :  { %363 = vpow2.f32 %v248_v7  ;;  %v247_v9 = vsub.f32 %v349_v3, %v245_v8 }
 0x226   :  { %v250_v10 = vmul.f32 1.442695, %v247_v9 }
 0x228   :  { %365 = vpow2.f32 %v250_v10 }
 0x231   :  { %v364_v11 = vpop.eup %363 }
 0x232   :  { %254 = vrot.lane.b32.xlu0 %v364_v11, %s375_s3 }
 0x235   :  { %v366_v12 = vpop.eup %365 }
 0x236   :  { %256 = vrot.lane.b32.xlu1 %v366_v12, %s375_s3 }
 0x2a4   :  { %v255_v13 = vpop.permute.xlu0 %254 }
 0x2a5   :  { %v261_v14 = vsel %vm260_vm4, %v255_v13, 0.0 }
 0x2a6   :  { %262 = vadd.xlane.f32.xlu0 %v261_v14 }
 0x2a8   :  { %v257_v15 = vpop.permute.xlu1 %256 }
 0x2a9   :  { %v264_v16 = vsel %vm260_vm4, %v257_v15, 0.0 }
 0x2aa   :  { %265 = vadd.xlane.f32.xlu1 %v264_v16 }
 0x2bb   :  { %275 = vrot.lane.b32.xlu1 %v349_v3, %s376_s8 }
 0x2bc   :  { %273 = vrot.lane.b32.xlu0 %v346_v63, %s376_s8 }
 0x32f   :  { %v263_v17 = vpop.xlane.xlu0 %262 }
 0x330   :  { %367 = vrcp.f32 %v263_v17 }
 0x333   :  { %v266_v18 = vpop.xlane.xlu1 %265  ;;  %v274_v21 = vpop.permute.xlu0 %273 }
 0x334   :  { %369 = vrcp.f32 %v266_v18 }
 0x337   :  { %v276_v25 = vpop.permute.xlu1 %275 }
 0x33d   :  { %v368_v19 = vpop.eup %367 }
 0x33e   :  { %v268_v20 = vmul.f32 %v368_v19, %v364_v11 }
 0x340   :  { %v279_v22 = vmul.f32 %v274_v21, %v268_v20 }
 0x341   :  { %v370_v23 = vpop.eup %369 }
 0x342   :  { %v270_v24 = vmul.f32 %v370_v23, %v366_v12  ;;  %283 = vrot.lane.b32.xlu0 %v279_v22, %s375_s3 }
 0x344   :  { %v280_v26 = vmul.f32 %v276_v25, %v270_v24 }
 0x346   :  { %285 = vrot.lane.b32.xlu1 %v280_v26, %s375_s3 }
 0x3b4   :  { %v284_v27 = vpop.permute.xlu0 %283 }
 0x3b5   :  { %v289_v28 = vsel %vm260_vm4, %v284_v27, 0.0 }
 0x3b6   :  { %290 = vadd.xlane.f32.xlu0 %v289_v28 }
 0x3b8   :  { %v286_v29 = vpop.permute.xlu1 %285 }
 0x3b9   :  { %v292_v30 = vsel %vm260_vm4, %v286_v29, 0.0 }
 0x3ba   :  { %293 = vadd.xlane.f32.xlu1 %v292_v30 }
 0x43f   :  { %v291_v31 = vpop.xlane.xlu0 %290 }
 0x440   :  { %296 = vst.msk [vmem:[%s545_s4] sm:$0xff] %vm295_vm5, %v291_v31 }
 0x443   :  { %v294_v32 = vpop.xlane.xlu1 %293 }
 0x444   :  { %297 = vst.msk [vmem:[%s545_s4 + $0x8] sm:$0xff] %vm295_vm5, %v294_v32 }

</bundles_post_ra>
